<compile_context>
chip_gen: v5e
topology: v5e:2x2
jax: 0.10.0
libtpu: 0.0.40
codegen_flags: <defaults>
</compile_context>

<pallas_src>
import jax
import jax.numpy as jnp
from jax.experimental import pallas as pl
from jax.experimental.pallas import tpu as pltpu


def _round_up(x, m):
    return ((x + m - 1) // m) * m


def _patch_proj_kernel(x_ref, w_ref, b_ref, o_ref):
    # One MXU matmul per output tile: [tm, K] @ [K, tn] -> [tm, tn], f32 acc.
    acc = jnp.dot(x_ref[...], w_ref[...], preferred_element_type=jnp.float32)
    o_ref[...] = (acc + b_ref[...]).astype(o_ref.dtype)


def _pick_tile_m():
    # v6e (128 MiB VMEM) and v7x (3.2 TB/s HBM, per-step overhead relatively
    # larger): 1024-row tiles.  v5e / unknown: 512 (still well inside the
    # raised scoped-VMEM limit).
    try:
        kind = jax.devices()[0].device_kind.lower()
    except Exception:
        return 512
    if "v6" in kind or "v7" in kind or "7x" in kind:
        return 1024
    return 512


def _pick_tile_n(D):
    # Lane-dense output tile: largest multiple of 128 <= 1024 that divides
    # round_up(D, 128), so no dead output columns beyond lane alignment.
    base = _round_up(D, 128)
    if base <= 1024:
        return base
    best = 128
    k = 1
    while 128 * k <= 1024:
        if base % (128 * k) == 0:
            best = 128 * k
        k += 1
    return best


def _tile_footprint_bytes(tm, K, tn, in_bytes, out_bytes):
    # Double-buffered x tile + weight tile + bias tile + output tile.
    return 2 * (tm * K * in_bytes + K * tn * in_bytes + tn * 4 + tm * tn * out_bytes)


def _patch_proj(x_patches, weight, bias, *, out_dtype):
    """Tiled [M, K] @ [K, D] + bias on the MXU (ragged tiles masked by Pallas)."""
    M, K = x_patches.shape
    K2, D = weight.shape
    assert K == K2, (K, K2)

    in_bytes = x_patches.dtype.itemsize
    out_bytes = jnp.dtype(out_dtype).itemsize

    tn = _pick_tile_n(D)
    tm = min(_pick_tile_m(), _round_up(M, 8))
    tm = max(8, _round_up(tm, 8))
    # Shrink tm if the double-buffered footprint would get tight (v7x: 64 MiB).
    while tm > 256 and _tile_footprint_bytes(tm, K, tn, in_bytes, out_bytes) > (24 << 20):
        tm //= 2

    # j (weight tile) is the OUTER axis so the [K, tn] weight block keeps a
    # constant block index across the inner M loop and stays resident in VMEM.
    grid = (pl.cdiv(D, tn), pl.cdiv(M, tm))

    footprint = _tile_footprint_bytes(tm, K, tn, in_bytes, out_bytes)
    vmem_limit = int(min(64 << 20, max(16 << 20, footprint * 3 // 2 + (4 << 20))))

    cost = pl.CostEstimate(
        flops=2 * M * K * D,
        transcendentals=0,
        bytes_accessed=((M * K + K * D) * in_bytes
                        + D * bias.dtype.itemsize
                        + M * D * out_bytes),
    )

    return pl.pallas_call(
        _patch_proj_kernel,
        out_shape=jax.ShapeDtypeStruct((M, D), out_dtype),
        grid_spec=pltpu.PrefetchScalarGridSpec(
            num_scalar_prefetch=0,
            grid=grid,
            in_specs=[
                pl.BlockSpec((tm, K), lambda j, i: (i, 0)),   # streams over M
                pl.BlockSpec((K, tn), lambda j, i: (0, j)),   # resident per j
                pl.BlockSpec((1, tn), lambda j, i: (0, j)),   # bias per j
            ],
            out_specs=pl.BlockSpec((tm, tn), lambda j, i: (i, j)),
        ),
        compiler_params=pltpu.CompilerParams(
            dimension_semantics=("parallel", "parallel"),
            vmem_limit_bytes=vmem_limit,
            # Let XLA fuse the patch-extraction transpose / cast / K-pad chain
            # into this kernel's input reads (no-op if XLA declines).
            allow_input_fusion=[True, False, False],
        ),
        cost_estimate=cost,
    )(x_patches, weight, bias)


class PatchEmbedding:
    """JAX/Pallas port of the PyTorch `patch_embedding` module (padding=False)."""

    def __init__(self, image_size, patch_size, input_channels,
                 patch_embedding_dim, flatten=True, bias=True,
                 compute_dtype=jnp.bfloat16, out_dtype=None, key=None):
        assert isinstance(image_size, tuple)
        assert isinstance(patch_size, tuple)
        H, W = image_size
        ph, pw = patch_size
        assert H % ph == 0, f"image height {H} not divisible by patch height {ph}"
        assert W % pw == 0, f"image width {W} not divisible by patch width {pw}"
        self.image_size = image_size
        self.patch_size = patch_size
        self.input_channels = input_channels
        self.embed_dim = patch_embedding_dim
        self.flatten = flatten
        self.compute_dtype = compute_dtype
        self.out_dtype = compute_dtype if out_dtype is None else out_dtype
        self.num_patches = (H // ph) * (W // pw)

        # Deterministic parameter init (mimics PyTorch Conv2d default:
        # uniform(-1/sqrt(fan_in), 1/sqrt(fan_in))).
        if key is None:
            key = jax.random.PRNGKey(0)
        k_w, k_b = jax.random.split(key)
        fan_in = input_channels * ph * pw
        bound = 1.0 / jnp.sqrt(fan_in)
        # Conv weight layout matches PyTorch: [D, C, ph, pw] (kept in f32).
        self.conv_weight = jax.random.uniform(
            k_w, (patch_embedding_dim, input_channels, ph, pw),
            dtype=jnp.float32, minval=-bound, maxval=bound)
        if bias:
            self.conv_bias = jax.random.uniform(
                k_b, (patch_embedding_dim,), dtype=jnp.float32,
                minval=-bound, maxval=bound)
        else:
            self.conv_bias = jnp.zeros((patch_embedding_dim,), jnp.float32)

        # Flattened matmul view: [K, D] with K ordered (C, ph, pw), K zero-padded
        # to a lane-aligned multiple of 128 (exact for the dot).  Weight held in
        # bf16 (MXU operand dtype); bias stays f32.
        self.k_dim = fan_in
        self.k_pad = _round_up(fan_in, 128)
        w2d = self.conv_weight.reshape(patch_embedding_dim, fan_in).T
        if self.k_pad != self.k_dim:
            w2d = jnp.pad(w2d, ((0, self.k_pad - self.k_dim), (0, 0)))
        self.w_mat = w2d.astype(compute_dtype)
        self.b_mat = self.conv_bias.reshape(1, patch_embedding_dim).astype(jnp.float32)

    def __call__(self, x):
        # x: NCHW [B, C, H, W]
        B, C, H, W = x.shape
        ph, pw = self.patch_size
        Hp, Wp = H // ph, W // pw

        # TODO(synk): fully fold this patch-extraction transpose into the
        # kernel's input DMA (per-patch-row grid axis + in-VMEM minor
        # transpose); today we rely on allow_input_fusion to let XLA fuse this
        # producer chain into the kernel's input reads.
        xp = x.reshape(B, C, Hp, ph, Wp, pw)
        xp = xp.transpose(0, 2, 4, 1, 3, 5)            # [B, Hp, Wp, C, ph, pw]
        xp = xp.reshape(B * Hp * Wp, C * ph * pw)      # [M, K]
        xp = xp.astype(self.compute_dtype)             # bf16 MXU operand
        if self.k_pad != self.k_dim:
            xp = jnp.pad(xp, ((0, 0), (0, self.k_pad - self.k_dim)))

        out = _patch_proj(xp, self.w_mat, self.b_mat, out_dtype=self.out_dtype)

        if self.flatten:
            # matches torch: x.flatten(2).transpose(1,2) -> [B, N, D]
            return out.reshape(B, Hp * Wp, self.embed_dim)
        # TODO(synk): emit [B, D, Hp, Wp] directly from the kernel via the
        # output BlockSpec to avoid this extra HBM transpose.
        return out.reshape(B, Hp, Wp, self.embed_dim).transpose(0, 3, 1, 2)


def _reference_forward(x, conv_weight, conv_bias, patch_size, flatten):
    """Plain-JAX f32 reference using lax.conv (NCHW) for correctness check."""
    out = jax.lax.conv_general_dilated(
        x, conv_weight, window_strides=patch_size, padding="VALID",
        dimension_numbers=("NCHW", "OIHW", "NCHW"))
    out = out + conv_bias.reshape(1, -1, 1, 1)
    if flatten:
        B, D, Hp, Wp = out.shape
        out = out.reshape(B, D, Hp * Wp).transpose(0, 2, 1)
    return out


if __name__ == "__main__":
    # Small shapes: B=2, C=4, 16x16 image, 4x4 patches, embed dim 32.
    B, C, H, W = 2, 4, 16, 16
    patch = (4, 4)
    D = 32

    key = jax.random.PRNGKey(0)
    k_x, k_p = jax.random.split(key)
    x = jax.random.normal(k_x, (B, C, H, W), dtype=jnp.float32)

    module = PatchEmbedding((H, W), patch, C, D, flatten=True, bias=True, key=k_p)

    out = module(x)
    out = jax.block_until_ready(out)

    ref = _reference_forward(x, module.conv_weight, module.conv_bias, patch, True)
    ref = jax.block_until_ready(ref)

    assert out.shape == (B, module.num_patches, D), out.shape
    # Tolerance accounts for bf16 operands and bf16 output (accumulation is f32).
    err = jnp.max(jnp.abs(out.astype(jnp.float32) - ref))
    assert jnp.allclose(out.astype(jnp.float32), ref, atol=3e-2, rtol=3e-2), \
        f"max abs err {err}"

    print("KERNEL_OK")
</pallas_src>

<mosaic_0001>
module attributes {stable_mosaic.version = 11 : i64} {
  func.func @_patch_proj_kernel(%arg0: i32, %arg1: i32, %arg2: memref<32x128xbf16, #tpu.memory_space<vmem>>, %arg3: memref<128x128xbf16, #tpu.memory_space<vmem>>, %arg4: memref<1x128xf32, #tpu.memory_space<vmem>>, %arg5: memref<32x128xbf16, #tpu.memory_space<vmem>>) attributes {dimension_semantics = [#tpu.dimension_semantics<parallel>, #tpu.dimension_semantics<parallel>], iteration_bounds = array<i64: 1, 1>, scalar_prefetch = 0 : i64, scratch_operands = 0 : i64, tpu.core_type = #tpu.core_type<tc>, window_params = [{transform_indices = @transform_0, window_bounds = array<i64: 32, 128>}, {transform_indices = @transform_1, window_bounds = array<i64: 128, 128>}, {transform_indices = @transform_2, window_bounds = array<i64: 1, 128>}, {transform_indices = @transform_3, window_bounds = array<i64: 32, 128>}]} {
    %c0 = arith.constant 0 : index
    %c0_0 = arith.constant 0 : index
    %0 = vector.load %arg2[%c0, %c0_0] : memref<32x128xbf16, #tpu.memory_space<vmem>>, vector<32x128xbf16>
    %c0_1 = arith.constant 0 : index
    %c0_2 = arith.constant 0 : index
    %1 = vector.load %arg3[%c0_1, %c0_2] : memref<128x128xbf16, #tpu.memory_space<vmem>>, vector<128x128xbf16>
    %cst = arith.constant dense<0.000000e+00> : vector<32x128xf32>
    %2 = tpu.matmul %0, %1, %cst {dimension_numbers = #tpu.dot_dimension_numbers<[1], [0], [0], [1], [0, 0, 1, 1], [], []>} : vector<32x128xbf16>, vector<128x128xbf16>, vector<32x128xf32> -> vector<32x128xf32>
    %c0_3 = arith.constant 0 : index
    %c0_4 = arith.constant 0 : index
    %3 = vector.load %arg4[%c0_3, %c0_4] : memref<1x128xf32, #tpu.memory_space<vmem>>, vector<1x128xf32>
    %4 = vector.broadcast %3 : vector<1x128xf32> to vector<32x128xf32>
    %5 = arith.addf %2, %4 : vector<32x128xf32>
    %6 = arith.truncf %5 : vector<32x128xf32> to vector<32x128xbf16>
    %c0_5 = arith.constant 0 : index
    %c0_6 = arith.constant 0 : index
    %7 = vector.load %arg5[%c0_5, %c0_6] : memref<32x128xbf16, #tpu.memory_space<vmem>>, vector<32x128xbf16>
    tpu.vector_store %arg5[%c0_5, %c0_6], %6 {strides = array<i32>} : memref<32x128xbf16, #tpu.memory_space<vmem>>, vector<32x128xbf16>,
    return
  }
  func.func @transform_0(%arg0: i32, %arg1: i32) -> (i32, i32) {
    %c0_i32 = arith.constant 0 : i32
    %c0_i32_0 = arith.constant 0 : i32
    return %arg1, %c0_i32 : i32, i32
  }
  func.func @transform_1(%arg0: i32, %arg1: i32) -> (i32, i32) {
    %c0_i32 = arith.constant 0 : i32
    %c0_i32_0 = arith.constant 0 : i32
    return %c0_i32, %arg0 : i32, i32
  }
  func.func @transform_2(%arg0: i32, %arg1: i32) -> (i32, i32) {
    %c0_i32 = arith.constant 0 : i32
    %c0_i32_0 = arith.constant 0 : i32
    return %c0_i32, %arg0 : i32, i32
  }
  func.func @transform_3(%arg0: i32, %arg1: i32) -> (i32, i32) {
    %c0_i32 = arith.constant 0 : i32
    return %arg1, %arg0 : i32, i32
  }
}

</mosaic_0001>

<bundles_post_ra>
// kernel: tpu_custom_call.1
= control target key start
LH: loop header
LB: loop body
LE: loop exit
PB: predicated region body
PF: predicated region fallthrough
CT: control target
= control target key end

     0   :  { %s302_s0 = inlined_call_operand.vmem [shape: bf16[32,128], index: 0, kind: input, shape index: {}]   ;;  %s303_s1 = inlined_call_operand.vmem [shape: bf16[128,32], index: 1, kind: input, shape index: {}]   ;;  %s304_s2 = inlined_call_operand.vmem [shape: f32[1,32], index: 2, kind: input, shape index: {}]   ;;  %s305_s3 = inlined_call_operand.hbm [shape: bf16[32,32], index: 3, kind: output, shape index: {}]  }
   0x1   :  { %v193_v0 = vld [vmem:[%s303_s1 + $0x38] sm:$0xff]  ;;  %v192_v1 = vld [vmem:[%s303_s1 + $0x30] sm:$0xff] }
   0x2   :  { %99 = vmatpush.bf16.msra.mxu0 %v193_v0  ;;  %205 = vmatpush.bf16.msra.mxu1 %v193_v0 }
   0x3   :  { %8 = vsyncpa [#allocation3], 0  ;;  %v191_v2 = vld [vmem:[%s303_s1 + $0x28] sm:$0xff]  ;;  %v190_v3 = vld [vmem:[%s303_s1 + $0x20] sm:$0xff]  ;;  %s132_s10 = sshll.u32 %s305_s3, 4  ;;  %s133_s10 = int_to_ptr.hbm [resolvable:$true] %s132_s10 }
   0x4   :  { %v189_v4 = vld [vmem:[%s303_s1 + $0x18] sm:$0xff]  ;;  %v188_v5 = vld [vmem:[%s303_s1 + $0x10] sm:$0xff]  ;;  %v187_v6 = vld [vmem:[%s303_s1 + $0x8] sm:$0xff] }
   0x5   :  { %v186_v7 = vld [vmem:[%s303_s1] sm:$0xff]  ;;  %v185_v9 = vld [vmem:[%s302_s0 + $0x8] sm:$0xff]  ;;  %s243_s1 = smov [#allocation2]  }
   0x6   :  { %100 = vmatpush.bf16.msra.mxu0 %v192_v1  ;;  %206 = vmatpush.bf16.msra.mxu1 %v192_v1  ;;  %v184_v8 = vld [vmem:[%s302_s0] sm:$0xff]  ;;  %s130_s7 = sshll.u32 %s243_s1, 4  ;;  %s244_s0 = smov 64   ;;  %s131_s7 = int_to_ptr.vmem [resolvable:$true] %s130_s7 }
   0x7   :  { %v216_v12 = vld [vmem:[%s304_s2] ss:$0 sm:$0xff]  ;;  %s245_s2 = smov 4  }
   0xa   :  { %101 = vmatpush.bf16.msra.mxu0 %v191_v2  ;;  %207 = vmatpush.bf16.msra.mxu1 %v191_v2 }
   0xe   :  { %102 = vmatpush.bf16.msra.mxu0 %v190_v3  ;;  %208 = vmatpush.bf16.msra.mxu1 %v190_v3 }
  0x12   :  { %103 = vmatpush.bf16.msra.mxu0 %v189_v4  ;;  %209 = vmatpush.bf16.msra.mxu1 %v189_v4 }
  0x16   :  { %104 = vmatpush.bf16.msra.mxu0 %v188_v5  ;;  %210 = vmatpush.bf16.msra.mxu1 %v188_v5 }
  0x1a   :  { %105 = vmatpush.bf16.msra.mxu0 %v187_v6  ;;  %211 = vmatpush.bf16.msra.mxu1 %v187_v6 }
  0x1e   :  { %106 = vmatpush.bf16.msra.mxu0 %v186_v7  ;;  %212 = vmatpush.bf16.msra.mxu1 %v186_v7 }
  0x21   :  { %107 = vmatmul.bf16.vlgmr.msra.gmra.mxu0 %v184_v8  ;;  %112 = vmatmul.bf16.vlgmr.msra.gmra.mxu1 %v185_v9 }
  0x9e   :  { %v108_v10 = vpop.f32.mrf.mxu0  ;;  %v113_v11 = vpop.f32.mrf.mxu1 }
  0x9f   :  { %v109_v15 = vadd.f32 %v216_v12, %v108_v10  ;;  %v114_v16 = vadd.f32 %v216_v12, %v113_v11 }
  0xa6   :  { %v110_v13 = vpop.f32.mrf.mxu0  ;;  %v115_v14 = vpop.f32.mrf.mxu1 }
  0xa7   :  { %v111_v17 = vadd.f32 %v216_v12, %v110_v13  ;;  %v116_v18 = vadd.f32 %v216_v12, %v115_v14 }
  0xa9   :  { %v197_v19 = vpack.c.bf16 %v111_v17, %v109_v15  ;;  %v202_v20 = vpack.c.bf16 %v116_v18, %v114_v16 }
  0xab   :  { %198 = vst [vmem:[#allocation2] sm:$0xff] %v197_v19  }
  0xac   :  { %204 = vst [vmem:[#allocation2 + $0x8] sm:$0xff] %v202_v20  }
  0xad   :  { %138 = dma.vmem_to_hbm [thread:$0]  %s131_s7, 256, %s133_s10, [#allocation3], %s244_s0, %s244_s0, %s245_s2  }
  0xae   :  { %241 = dma.done.wait [#allocation3], 256  }
  0xaf   :  { %242 = vsyncadd [#allocation3], 4294967040 }
  0xb0   :  { %143 = vsyncpa [#allocation3], 1 }

</bundles_post_ra>
